<compile_context>
chip_gen: v7x
topology: tpu7x:2x2x1
jax: 0.10.0
libtpu: 0.0.40
codegen_flags: <defaults>
</compile_context>

<pallas_src>
import jax
import jax.numpy as jnp
from jax.experimental import pallas as pl
from jax.experimental.pallas import tpu as pltpu

IN_CHANNELS = 1
IMG_H = 28
IMG_W = 28
INPUT_SIZE = IN_CHANNELS * IMG_H * IMG_W  # 784
NUM_CLASSES = 26
SUBLANE = 8        # f32 sublane granularity
TILE_B_MAX = 2048  # largest batch tile; ~15 MiB double-buffered, fits scoped VMEM everywhere


def _round_up(x, m):
    return (x + m - 1) // m * m


def _linear_kernel(x_ref, w_ref, b_ref, o_ref):
    # x_ref: (tile_b, 784) f32   w_ref: (784, 26) f32
    # b_ref: (1, 26)      f32   o_ref: (tile_b, 26) f32
    acc = jnp.dot(x_ref[...], w_ref[...], preferred_element_type=jnp.float32)
    o_ref[...] = acc + b_ref[...]  # bias add on the f32 VPU path (free; VALU slack)


def prepare_params(weight, bias):
    """One-time parameter prep (hoisted out of the per-call path).

    weight: (26, 784) f32 (nn.Linear convention) -> (784, 26) f32
    bias:   (26,)     f32                        -> (1, 26)   f32
    """
    w_t = jnp.transpose(weight).astype(jnp.float32)
    b_row = bias.astype(jnp.float32).reshape(1, NUM_CLASSES)
    return w_t, b_row


def _batch_tiling(batch):
    """Pick (tile_b, grid_steps): >=2 grid steps whenever possible so v7x's 2 TCs share work."""
    if batch <= SUBLANE:
        return batch, 1
    rows = _round_up(batch, SUBLANE)
    tile_b = min(TILE_B_MAX, _round_up(pl.cdiv(rows, 2), SUBLANE))
    return tile_b, pl.cdiv(batch, tile_b)


@jax.jit
def asl_model_forward(xb, w_t, b_row):
    """Forward pass of ASLModel.

    xb:    (B, 1, 28, 28) float32 (NCHW, as in PyTorch)
    w_t:   (784, 26) float32  (from prepare_params, precomputed once)
    b_row: (1, 26)   float32  (from prepare_params, precomputed once)
    returns (B, 26) float32 logits
    """
    B = xb.shape[0]
    x2d = xb.reshape(B, INPUT_SIZE)          # same as torch .reshape; layout-only, no HBM pass
    tile_b, steps = _batch_tiling(B)

    return pl.pallas_call(
        _linear_kernel,
        out_shape=jax.ShapeDtypeStruct((B, NUM_CLASSES), jnp.float32),
        grid=(steps,),
        in_specs=[
            # activations: pipelined per batch tile (double-buffered by default)
            pl.BlockSpec((tile_b, INPUT_SIZE), lambda i: (i, 0)),
            # weight & bias: constant index_map -> DMA'd once, VMEM-resident; single-buffered
            pl.BlockSpec((INPUT_SIZE, NUM_CLASSES), lambda i: (0, 0),
                         pipeline_mode=pl.Buffered(1)),
            pl.BlockSpec((1, NUM_CLASSES), lambda i: (0, 0),
                         pipeline_mode=pl.Buffered(1)),
        ],
        out_specs=pl.BlockSpec((tile_b, NUM_CLASSES), lambda i: (i, 0)),
        compiler_params=pltpu.CompilerParams(
            dimension_semantics=("parallel",),   # shard batch tiles across TCs on v7x
        ),
    )(x2d, w_t, b_row)


def init_params(key):
    """Deterministic init mimicking nn.Linear default (uniform +/- 1/sqrt(fan_in))."""
    kw, kb = jax.random.split(key)
    bound = 1.0 / float(INPUT_SIZE) ** 0.5
    weight = jax.random.uniform(
        kw, (NUM_CLASSES, INPUT_SIZE), dtype=jnp.float32, minval=-bound, maxval=bound
    )
    bias = jax.random.uniform(
        kb, (NUM_CLASSES,), dtype=jnp.float32, minval=-bound, maxval=bound
    )
    return weight, bias


# TODO(synk): training_step / validation_* / evaluate / accuracy (cross_entropy, argmax
# metrics) are host-side loss/eval utilities, not part of the forward pass; not kernels.

if __name__ == "__main__":
    key = jax.random.PRNGKey(0)
    k_params, k_x = jax.random.split(key)

    weight, bias = init_params(k_params)

    # Small batch with shapes dictated by the module: (B, 1, 28, 28).
    # B=10 deliberately exercises the 2-step parallel grid and the ragged last tile.
    B = 10
    xb = jax.random.normal(k_x, (B, IN_CHANNELS, IMG_H, IMG_W), dtype=jnp.float32)

    # Parameter prep happens once (hoisted out of the per-call path).
    w_t, b_row = prepare_params(weight, bias)

    logits = jax.block_until_ready(asl_model_forward(xb, w_t, b_row))

    # Reference: the original full-f32 PyTorch math.
    ref = jnp.dot(xb.reshape(B, INPUT_SIZE), weight.T,
                  precision=jax.lax.Precision.HIGHEST) + bias

    assert logits.shape == (B, NUM_CLASSES), logits.shape
    assert bool(jnp.all(jnp.isfinite(logits))), "non-finite logits"
    assert jnp.allclose(logits, ref, atol=2e-2, rtol=2e-2), "mismatch vs f32 reference"

    print("KERNEL_OK")
</pallas_src>

<mosaic_0001>
module attributes {stable_mosaic.version = 11 : i64} {
  func.func @_linear_kernel(%arg0: i32, %arg1: memref<8x784xf32, #tpu.memory_space<vmem>>, %arg2: memref<784x26xf32, #tpu.memory_space<vmem>>, %arg3: memref<1x26xf32, #tpu.memory_space<vmem>>, %arg4: memref<8x26xf32, #tpu.memory_space<vmem>>) attributes {dimension_semantics = [#tpu.dimension_semantics<parallel>], iteration_bounds = array<i64: 2>, scalar_prefetch = 0 : i64, scratch_operands = 0 : i64, tpu.core_type = #tpu.core_type<tc>, window_params = [{transform_indices = @transform_0, window_bounds = array<i64: 8, 784>}, {pipeline_mode = #tpu.pipeline_mode<synchronous>, transform_indices = @transform_1, window_bounds = array<i64: 784, 26>}, {pipeline_mode = #tpu.pipeline_mode<synchronous>, transform_indices = @transform_2, window_bounds = array<i64: 1, 26>}, {transform_indices = @transform_3, window_bounds = array<i64: 8, 26>}]} {
    %c0 = arith.constant 0 : index
    %c0_0 = arith.constant 0 : index
    %0 = vector.load %arg1[%c0, %c0_0] : memref<8x784xf32, #tpu.memory_space<vmem>>, vector<8x784xf32>
    %c0_1 = arith.constant 0 : index
    %c0_2 = arith.constant 0 : index
    %1 = vector.load %arg2[%c0_1, %c0_2] : memref<784x26xf32, #tpu.memory_space<vmem>>, vector<784x26xf32>
    %cst = arith.constant dense<0.000000e+00> : vector<8x26xf32>
    %2 = tpu.matmul %0, %1, %cst {dimension_numbers = #tpu.dot_dimension_numbers<[1], [0], [0], [1], [0, 0, 1, 1], [], []>} : vector<8x784xf32>, vector<784x26xf32>, vector<8x26xf32> -> vector<8x26xf32>
    %c0_3 = arith.constant 0 : index
    %c0_4 = arith.constant 0 : index
    %3 = vector.load %arg3[%c0_3, %c0_4] : memref<1x26xf32, #tpu.memory_space<vmem>>, vector<1x26xf32>
    %4 = vector.broadcast %3 : vector<1x26xf32> to vector<8x26xf32>
    %5 = arith.addf %2, %4 : vector<8x26xf32>
    %c0_5 = arith.constant 0 : index
    %c0_6 = arith.constant 0 : index
    %6 = vector.load %arg4[%c0_5, %c0_6] : memref<8x26xf32, #tpu.memory_space<vmem>>, vector<8x26xf32>
    tpu.vector_store %arg4[%c0_5, %c0_6], %5 {strides = array<i32>} : memref<8x26xf32, #tpu.memory_space<vmem>>, vector<8x26xf32>,
    return
  }
  func.func @transform_0(%arg0: i32) -> (i32, i32) {
    %c0_i32 = arith.constant 0 : i32
    %c0_i32_0 = arith.constant 0 : i32
    return %arg0, %c0_i32 : i32, i32
  }
  func.func @transform_1(%arg0: i32) -> (i32, i32) {
    %c0_i32 = arith.constant 0 : i32
    %c0_i32_0 = arith.constant 0 : i32
    %c0_i32_1 = arith.constant 0 : i32
    return %c0_i32, %c0_i32_0 : i32, i32
  }
  func.func @transform_2(%arg0: i32) -> (i32, i32) {
    %c0_i32 = arith.constant 0 : i32
    %c0_i32_0 = arith.constant 0 : i32
    %c0_i32_1 = arith.constant 0 : i32
    return %c0_i32, %c0_i32_0 : i32, i32
  }
  func.func @transform_3(%arg0: i32) -> (i32, i32) {
    %c0_i32 = arith.constant 0 : i32
    %c0_i32_0 = arith.constant 0 : i32
    return %arg0, %c0_i32 : i32, i32
  }
}

</mosaic_0001>

<bundles_post_ra>
// kernel: asl_model_forward.1
= control target key start
LH: loop header
LB: loop body
LE: loop exit
PB: predicated region body
PF: predicated region fallthrough
CT: control target
= control target key end

     0   :  { %8 = vsyncpa [#allocation3], 0  ;;  %s1408_s0 = inlined_call_operand.vmem [shape: f32[10,784], index: 0, kind: input, shape index: {}]   ;;  %s1409_s1 = inlined_call_operand.vmem [shape: f32[784,26], index: 1, kind: input, shape index: {}]   ;;  %s1410_s2 = inlined_call_operand.vmem [shape: f32[1,26], index: 2, kind: input, shape index: {}]   ;;  %s1411_s3 = inlined_call_operand.hbm [shape: f32[10,26], index: 3, kind: output, shape index: {}]  }
   0x1   :  { %10 = vsyncpa [#allocation3 + $0x1], 0  ;;  %s997_s12 = smov 0   ;;  %s999_s13 = smov 0  }
   0x2   :  { %s1001_s14 = smov 0   ;;  %s1003_s15 = smov 0  }
   0x3 LB: > { %s1018_s16 = sadd.s32 4294967295, %s971_s15   ;;  %s640_s17 = sadd.s32 4294967294, %s971_s15   ;;  %s971_s15 = sphi %s1003_s15, %s1417_s15   ;;  %s967_s14 = sphi %s1001_s14, %s1416_s14   ;;  %s963_s13 = sphi %s999_s13, %s1415_s13   ;;  %s959_s12 = sphi %s997_s12, %s1414_s12  }
   0x4   : > { %s1022_s18 = sadd.s32 1, %s971_s15   ;;  %s91_s19 = sadd.s32 1, %s967_s14 }
   0x5   : > { %s88_s20 = ssub.s32 %s971_s15, %s1022_s18  ;;  %p101_p0 = scmp.ne.s32.totalorder %s967_s14, %s963_s13 }
   0x6   : > { %p89_p1 = scmp.eq.s32.totalorder %s88_s20, 0  ;;  %p102_p2 = scmp.eq.s32.totalorder %s1018_s16, 1 }
   0x7   : > { %p107_p3 = scmp.ne.s32.totalorder %s963_s13, %s959_s12  ;;  %p108_p4 = scmp.eq.s32.totalorder %s640_s17, 1 }
   0x8   : > { %s1033_s21 = scalar_select %p89_p1, %s967_s14, %s91_s19  }
   0x9   : > { %p1035_p5 = por %p102_p2, %p101_p0  ;;  %p1039_p6 = por %p108_p4, %p107_p3 }
   0xa   : > { %p643_p7 = scmp.ge.s32.totalorder %s971_s15, 1  ;;  %p140_p8 = scmp.lt.s32.totalorder %s971_s15, 3 }
   0xc   : > { %p141_p9 = pnand %p643_p7, %p140_p8 }
   0xd   : > { %v192_v0 = vld [vmem:[%s1409_s1 + $0x80] sm:$0xff] (!%p141_p9)  ;;  %v193_v1 = vld [vmem:[%s1409_s1 + $0x88] sm:$0xff] (!%p141_p9)  ;;  %v194_v11 = vld [vmem:[%s1409_s1 + $0x90] sm:$0xff] (!%p141_p9)  ;;  %p164_p10 = scmp.lt.s32.totalorder (!%p141_p9), %s1018_s16, 1  ;;  %vm974_vm0 = vmmov (!%p141_p9), 0   ;;  %vm281_vm1 = vcmask (!%p141_p9), 130048  }
   0xe   : > { %144 = sbr.rel (%p141_p9) target bundleno = 313 (0x139), region = 32  ;;  %v176_v2 = vld [vmem:[%s1409_s1] sm:$0xff] (!%p141_p9)  ;;  %v767_v3 = vpack.c.bf16 (!%p141_p9), %v193_v1, %v192_v0  ;;  %v177_v4 = vld [vmem:[%s1409_s1 + $0x8] sm:$0xff] (!%p141_p9)  ;;  %v195_v13 = vld [vmem:[%s1409_s1 + $0x98] sm:$0xff] (!%p141_p9)  ;;  %s161_s10 = sand.u32 (!%p141_p9), 1, %s963_s13   ;;  %vm565_vm2 = vcmask (!%p141_p9), 211968  }
   0xf   : > { %v224_v5 = vld [vmem:[%s1409_s1 + $0x180] sm:$0xff] (!%p141_p9)  ;;  %v225_v6 = vld [vmem:[%s1409_s1 + $0x188] sm:$0xff] (!%p141_p9)  ;;  %v769_v7 = vpack.c.bf16 (!%p141_p9), %v177_v4, %v176_v2  ;;  %v178_v14 = vld [vmem:[%s1409_s1 + $0x10] sm:$0xff] (!%p141_p9)  ;;  %v771_v16 = vpack.c.bf16 (!%p141_p9), %v195_v13, %v194_v11  ;;  %s644_s11 = sshll.u32 (!%p141_p9), %s161_s10, 3  ;;  %s568_s24 = scalar_lea.sflag (!%p141_p9), [#allocation3], %s161_s10 }
  0x10   : > { %v799_v8 = vpack.c.bf16 (!%p141_p9), %v225_v6, %v224_v5  ;;  %v208_v9 = vld [vmem:[%s1409_s1 + $0x100] sm:$0xff] (!%p141_p9)  ;;  %v209_v10 = vld [vmem:[%s1409_s1 + $0x108] sm:$0xff] (!%p141_p9)  ;;  %768 = vmatprep.subr.bf16.mxu0 (!%p141_p9), %v767_v3  ;;  %v179_v15 = vld [vmem:[%s1409_s1 + $0x18] sm:$0xff] (!%p141_p9)  ;;  %s163_s17 = scalar_lea.vmem (!%p141_p9), [#allocation2], %s644_s11 }
  0x11   : > { %v801_v12 = vpack.c.bf16 (!%p141_p9), %v209_v10, %v208_v9  ;;  %770 = vmatpush3.bf16.msra.mxu0 (!%p141_p9), %v769_v7  ;;  %v773_v17 = vpack.c.bf16 (!%p141_p9), %v179_v15, %v178_v14  ;;  %v226_v18 = vld [vmem:[%s1409_s1 + $0x190] sm:$0xff] (!%p141_p9)  ;;  %v227_v19 = vld [vmem:[%s1409_s1 + $0x198] sm:$0xff] (!%p141_p9)  ;;  %v196_v23 = vld [vmem:[%s1409_s1 + $0xa0] sm:$0xff] (!%p141_p9)  ;;  %s581_s19 = sshll.u32 (!%p141_p9), %s163_s17, 4  ;;  %s1368_s19 = int_to_ptr.vmem [resolvable:$true] %s581_s19 }
  0x12   : > { %800 = vmatprep.subr.bf16.mxu1 (!%p141_p9), %v799_v8  ;;  %v210_v20 = vld [vmem:[%s1409_s1 + $0x110] sm:$0xff] (!%p141_p9)  ;;  %v803_v21 = vpack.c.bf16 (!%p141_p9), %v227_v19, %v226_v18  ;;  %v211_v22 = vld [vmem:[%s1409_s1 + $0x118] sm:$0xff] (!%p141_p9)  ;;  %v197_v24 = vld [vmem:[%s1409_s1 + $0xa8] sm:$0xff] (!%p141_p9)  ;;  %772 = vmatprep.subr.bf16.mxu0 (!%p141_p9), %v771_v16  ;;  %s909_s25 = scalar_lea.vmem (!%p141_p9), %s1368_s19, 128 }
  0x13   : > { %802 = vmatpush3.bf16.msra.mxu1 (!%p141_p9), %v801_v12  ;;  %v805_v25 = vpack.c.bf16 (!%p141_p9), %v211_v22, %v210_v20  ;;  %v775_v26 = vpack.c.bf16 (!%p141_p9), %v197_v24, %v196_v23  ;;  %v180_v27 = vld [vmem:[%s1409_s1 + $0x20] sm:$0xff] (!%p141_p9)  ;;  %v181_v28 = vld [vmem:[%s1409_s1 + $0x28] sm:$0xff] (!%p141_p9)  ;;  %v198_v35 = vld [vmem:[%s1409_s1 + $0xb0] sm:$0xff] (!%p141_p9)  ;;  %p910_p11 = scmp.ne.s32.totalorder (!%p141_p9), %s1368_s19, %s909_s25 }
  0x14   : > { %v228_v29 = vld [vmem:[%s1409_s1 + $0x1a0] sm:$0xff] (!%p141_p9)  ;;  %804 = vmatprep.subr.bf16.mxu1 (!%p141_p9), %v803_v21  ;;  %v229_v30 = vld [vmem:[%s1409_s1 + $0x1a8] sm:$0xff] (!%p141_p9)  ;;  %v777_v33 = vpack.c.bf16 (!%p141_p9), %v181_v28, %v180_v27  ;;  %v199_v36 = vld [vmem:[%s1409_s1 + $0xb8] sm:$0xff] (!%p141_p9) }
  0x15   : > { %v212_v31 = vld [vmem:[%s1409_s1 + $0x120] sm:$0xff]  ;;  %v213_v32 = vld [vmem:[%s1409_s1 + $0x128] sm:$0xff]  ;;  %774 = vmatpush3.bf16.msra.mxu0 %v773_v17  ;;  %v807_v34 = vpack.c.bf16 %v229_v30, %v228_v29  ;;  %v182_v37 = vld [vmem:[%s1409_s1 + $0x30] sm:$0xff]  ;;  %v779_v39 = vpack.c.bf16 %v199_v36, %v198_v35  ;;  %s1139_s30 = scalar_select %p164_p10, %s1018_s16, 1 }
  0x16   : > { %776 = vmatprep.subr.bf16.mxu0 %v775_v26  ;;  %v809_v38 = vpack.c.bf16 %v213_v32, %v212_v31  ;;  %v183_v40 = vld [vmem:[%s1409_s1 + $0x38] sm:$0xff]  ;;  %v230_v41 = vld [vmem:[%s1409_s1 + $0x1b0] sm:$0xff]  ;;  %v200_v46 = vld [vmem:[%s1409_s1 + $0xc0] sm:$0xff]  ;;  %p911_p12 = pnand %p910_p11, %p1035_p5 }
  0x17   : > { %806 = vmatpush3.bf16.msra.mxu1 %v805_v25  ;;  %v231_v42 = vld [vmem:[%s1409_s1 + $0x1b8] sm:$0xff]  ;;  %v214_v44 = vld [vmem:[%s1409_s1 + $0x130] sm:$0xff]  ;;  %v201_v47 = vld [vmem:[%s1409_s1 + $0xc8] sm:$0xff]  ;;  %v781_v48 = vpack.c.bf16 %v183_v40, %v182_v37  ;;  %s866_s5 = smul.u32 56, %s1139_s30 }
  0x18   : > { %808 = vmatprep.subr.bf16.mxu1 %v807_v34  ;;  %v811_v43 = vpack.c.bf16 %v231_v42, %v230_v41  ;;  %v215_v45 = vld [vmem:[%s1409_s1 + $0x138] sm:$0xff]  ;;  %v232_v49 = vld [vmem:[%s1409_s1 + $0x1c0] sm:$0xff]  ;;  %v233_v50 = vld [vmem:[%s1409_s1 + $0x1c8] sm:$0xff]  ;;  %v783_v52 = vpack.c.bf16 %v201_v47, %v200_v46  ;;  %p912_p13 = pneg %p911_p12 }
  0x19   : > { %778 = vmatpush3.bf16.msra.mxu0 %v777_v33  ;;  %v813_v51 = vpack.c.bf16 %v215_v45, %v214_v44  ;;  %v184_v53 = vld [vmem:[%s1409_s1 + $0x40] sm:$0xff]  ;;  %v185_v54 = vld [vmem:[%s1409_s1 + $0x48] sm:$0xff]  ;;  %v815_v56 = vpack.c.bf16 %v233_v50, %v232_v49  ;;  %v202_v58 = vld [vmem:[%s1409_s1 + $0xd0] sm:$0xff]  ;;  %s1196_s7 = scalar_lea.vmem %s1408_s0, %s866_s5  ;;  %v973_v50 = vmov 0.0|0.0  }
  0x1a   : > { %780 = vmatprep.subr.bf16.mxu0 %v779_v39  ;;  %v216_v55 = vld [vmem:[%s1409_s1 + $0x140] sm:$0xff]  ;;  %v217_v57 = vld [vmem:[%s1409_s1 + $0x148] sm:$0xff]  ;;  %v203_v59 = vld [vmem:[%s1409_s1 + $0xd8] sm:$0xff]  ;;  %v785_v62 = vpack.c.bf16 %v185_v54, %v184_v53 }
  0x1b   : > { %810 = vmatpush3.bf16.msra.mxu1 %v809_v38  ;;  %v234_v60 = vld [vmem:[%s1409_s1 + $0x1d0] sm:$0xff]  ;;  %v235_v61 = vld [vmem:[%s1409_s1 + $0x1d8] sm:$0xff]  ;;  %v817_v63 = vpack.c.bf16 %v217_v57, %v216_v55  ;;  %v787_v0 = vpack.c.bf16 %v203_v59, %v202_v58  ;;  %v204_v6 = vld [vmem:[%s1409_s1 + $0xe0] sm:$0xff] }
  0x1c   : > { %812 = vmatprep.subr.bf16.mxu1 %v811_v43  ;;  %v186_v1 = vld [vmem:[%s1409_s1 + $0x50] sm:$0xff]  ;;  %v187_v2 = vld [vmem:[%s1409_s1 + $0x58] sm:$0xff]  ;;  %v819_v4 = vpack.c.bf16 %v235_v61, %v234_v60  ;;  %v205_v7 = vld [vmem:[%s1409_s1 + $0xe8] sm:$0xff]  ;;  %v975_v60 = vmov 0.0  }
  0x1d   : > { %782 = vmatpush3.bf16.msra.mxu0 %v781_v48  ;;  %v218_v3 = vld [vmem:[%s1409_s1 + $0x150] sm:$0xff]  ;;  %v219_v5 = vld [vmem:[%s1409_s1 + $0x158] sm:$0xff]  ;;  %v236_v8 = vld [vmem:[%s1409_s1 + $0x1e0] sm:$0xff]  ;;  %v789_v10 = vpack.c.bf16 %v187_v2, %v186_v1  ;;  %v791_v14 = vpack.c.bf16 %v205_v7, %v204_v6 }
  0x1e   : > { %784 = vmatprep.subr.bf16.mxu0 %v783_v52  ;;  %v237_v9 = vld [vmem:[%s1409_s1 + $0x1e8] sm:$0xff]  ;;  %v188_v11 = vld [vmem:[%s1409_s1 + $0x60] sm:$0xff]  ;;  %v821_v13 = vpack.c.bf16 %v219_v5, %v218_v3  ;;  %v206_v19 = vld [vmem:[%s1409_s1 + $0xf0] sm:$0xff] }
  0x1f   : > { %814 = vmatpush3.bf16.msra.mxu1 %v813_v51  ;;  %v170_v12 = vld [vmem:[%s1196_s7 + $0x8] sm:$0xff]  ;;  %v220_v16 = vld [vmem:[%s1409_s1 + $0x160] sm:$0xff]  ;;  %v823_v18 = vpack.c.bf16 %v237_v9, %v236_v8  ;;  %v207_v20 = vld [vmem:[%s1409_s1 + $0xf8] sm:$0xff] }
  0x20   : > { %816 = vmatprep.subr.bf16.mxu1 %v815_v56  ;;  %v189_v15 = vld [vmem:[%s1409_s1 + $0x68] sm:$0xff]  ;;  %349 = vmatprep.mubr.f32.mxu0 %v170_v12  ;;  %v172_v21 = vld [vmem:[%s1196_s7 + $0x18] sm:$0xff]  ;;  %v238_v22 = vld [vmem:[%s1409_s1 + $0x1f0] sm:$0xff]  ;;  %v795_v26 = vpack.c.bf16 %v207_v20, %v206_v19 }
  0x21   : > { %786 = vmatpush3.bf16.msra.mxu0 %v785_v62  ;;  %v221_v17 = vld [vmem:[%s1409_s1 + $0x168] sm:$0xff]  ;;  %v239_v23 = vld [vmem:[%s1409_s1 + $0x1f8] sm:$0xff]  ;;  %419 = vmatprep.mubr.f32.mxu1 %v172_v21  ;;  %v793_v24 = vpack.c.bf16 %v189_v15, %v188_v11  ;;  %v190_v27 = vld [vmem:[%s1409_s1 + $0x70] sm:$0xff] }
  0x22   : > { %788 = vmatprep.subr.bf16.mxu0 %v787_v0  ;;  %v825_v25 = vpack.c.bf16 %v221_v17, %v220_v16  ;;  %v191_v28 = vld [vmem:[%s1409_s1 + $0x78] sm:$0xff]  ;;  %v222_v29 = vld [vmem:[%s1409_s1 + $0x170] sm:$0xff]  ;;  %v827_v30 = vpack.c.bf16 %v239_v23, %v238_v22  ;;  %v256_v32 = vld [vmem:[%s1409_s1 + $0x280] sm:$0xff] }
  0x23   : > { %818 = vmatpush3.bf16.msra.mxu1 %v817_v63  ;;  %v223_v31 = vld [vmem:[%s1409_s1 + $0x178] sm:$0xff]  ;;  %v257_v33 = vld [vmem:[%s1409_s1 + $0x288] sm:$0xff]  ;;  %v797_v34 = vpack.c.bf16 %v191_v28, %v190_v27  ;;  %v240_v37 = vld [vmem:[%s1409_s1 + $0x200] sm:$0xff] }
  0x24   : > { %820 = vmatprep.subr.bf16.mxu1 %v819_v4  ;;  %v829_v35 = vpack.c.bf16 %v223_v31, %v222_v29  ;;  %v831_v36 = vpack.c.bf16 %v257_v33, %v256_v32  ;;  %v241_v38 = vld [vmem:[%s1409_s1 + $0x208] sm:$0xff]  ;;  %v258_v39 = vld [vmem:[%s1409_s1 + $0x290] sm:$0xff]  ;;  %v259_v40 = vld [vmem:[%s1409_s1 + $0x298] sm:$0xff] }
  0x25   : > { %790 = vmatpush3.bf16.msra.mxu0 %v789_v10  ;;  %v169_v41 = vld [vmem:[%s1196_s7] sm:$0xff]  ;;  %v833_v42 = vpack.c.bf16 %v241_v38, %v240_v37  ;;  %v171_v43 = vld [vmem:[%s1196_s7 + $0x10] sm:$0xff]  ;;  %v835_v45 = vpack.c.bf16 %v259_v40, %v258_v39  ;;  %v243_v46 = vld [vmem:[%s1409_s1 + $0x218] sm:$0xff] }
  0x26   : > { %792 = vmatprep.subr.bf16.mxu0 %v791_v14  ;;  %v242_v44 = vld [vmem:[%s1409_s1 + $0x210] sm:$0xff]  ;;  %v260_v47 = vld [vmem:[%s1409_s1 + $0x2a0] sm:$0xff]  ;;  %v261_v48 = vld [vmem:[%s1409_s1 + $0x2a8] sm:$0xff] }
  0x27   : > { %822 = vmatpush3.bf16.msra.mxu1 %v821_v13  ;;  %v174_v49 = vld [vmem:[%s1196_s7 + $0x28] sm:$0xff]  ;;  %v272_v51 = vld [vmem:[%s1409_s1 + $0x300] sm:$0xff]  ;;  %v837_v54 = vpack.c.bf16 %v243_v46, %v242_v44  ;;  %v839_v55 = vpack.c.bf16 %v261_v48, %v260_v47  ;;  %v262_v58 = vld [vmem:[%s1409_s1 + $0x2b0] sm:$0xff] }
  0x28   : > { %824 = vmatprep.subr.bf16.mxu1 %v823_v18  ;;  %v273_v52 = vld [vmem:[%s1409_s1 + $0x308] sm:$0xff]  ;;  %v244_v56 = vld [vmem:[%s1409_s1 + $0x220] sm:$0xff]  ;;  %v263_v59 = vld [vmem:[%s1409_s1 + $0x2b8] sm:$0xff] }
  0x29   : > { %794 = vmatpush3.bf16.msra.mxu0 %v793_v24  ;;  %v864_v53 = vpack.c.bf16 %v273_v52, %v272_v51  ;;  %v245_v57 = vld [vmem:[%s1409_s1 + $0x228] sm:$0xff]  ;;  %v175_v61 = vld [vmem:[%s1196_s7 + $0x30] sm:$0xff]  ;;  %v843_v63 = vpack.c.bf16 %v263_v59, %v262_v58  ;;  %v247_v1 = vld [vmem:[%s1409_s1 + $0x238] sm:$0xff] }
  0x2a   : > { %796 = vmatprep.subr.bf16.mxu0 %v795_v26  ;;  %v841_v62 = vpack.c.bf16 %v245_v57, %v244_v56  ;;  %v246_v0 = vld [vmem:[%s1409_s1 + $0x230] sm:$0xff]  ;;  %v264_v2 = vld [vmem:[%s1409_s1 + $0x2c0] sm:$0xff]  ;;  %v265_v3 = vld [vmem:[%s1409_s1 + $0x2c8] sm:$0xff] }
  0x2b   : > { %826 = vmatpush3.bf16.msra.mxu1 %v825_v25  ;;  %v845_v4 = vpack.c.bf16 %v247_v1, %v246_v0  ;;  %v847_v5 = vpack.c.bf16 %v265_v3, %v264_v2  ;;  %v248_v6 = vld [vmem:[%s1409_s1 + $0x240] sm:$0xff]  ;;  %v249_v7 = vld [vmem:[%s1409_s1 + $0x248] sm:$0xff]  ;;  %v266_v8 = vld [vmem:[%s1409_s1 + $0x2d0] sm:$0xff] }
  0x2c   : > { %828 = vmatprep.subr.bf16.mxu1 %v827_v30  ;;  %v267_v9 = vld [vmem:[%s1409_s1 + $0x2d8] sm:$0xff]  ;;  %v849_v10 = vpack.c.bf16 %v249_v7, %v248_v6  ;;  %v250_v12 = vld [vmem:[%s1409_s1 + $0x250] sm:$0xff]  ;;  %v268_v14 = vld [vmem:[%s1409_s1 + $0x2e0] sm:$0xff] }
  0x2d   : > { %798 = vmatpush3.bf16.msra.mxu0 %v797_v34  ;;  %v851_v11 = vpack.c.bf16 %v267_v9, %v266_v8  ;;  %v251_v13 = vld [vmem:[%s1409_s1 + $0x258] sm:$0xff]  ;;  %v269_v15 = vld [vmem:[%s1409_s1 + $0x2e8] sm:$0xff]  ;;  %v252_v18 = vld [vmem:[%s1409_s1 + $0x260] sm:$0xff] }
  0x2e   : > { %832 = vmatprep.subr.bf16.mxu0 %v831_v36  ;;  %v853_v16 = vpack.c.bf16 %v251_v13, %v250_v12  ;;  %v855_v17 = vpack.c.bf16 %v269_v15, %v268_v14  ;;  %v253_v19 = vld [vmem:[%s1409_s1 + $0x268] sm:$0xff]  ;;  %v270_v20 = vld [vmem:[%s1409_s1 + $0x2f0] sm:$0xff]  ;;  %v271_v21 = vld [vmem:[%s1409_s1 + $0x2f8] sm:$0xff] }
  0x2f   : > { %830 = vmatpush3.bf16.msra.mxu1 %v829_v35  ;;  %v857_v22 = vpack.c.bf16 %v253_v19, %v252_v18  ;;  %v859_v23 = vpack.c.bf16 %v271_v21, %v270_v20  ;;  %v254_v24 = vld [vmem:[%s1409_s1 + $0x270] sm:$0xff]  ;;  %v255_v25 = vld [vmem:[%s1409_s1 + $0x278] sm:$0xff]  ;;  %v173_v27 = vld [vmem:[%s1196_s7 + $0x20] sm:$0xff]  ;;  %s649_s7 = sshll.u32 %s1018_s16, 7  ;;  %s976_s16 = smov [#allocation2]  }
  0x30   : > { %863 = vmatprep.subr.bf16.mxu1 %v973_v50  ;;  %350 = vmatmul.mubr.f32.vlgmr.msra.gmra.mrb[0].mxu0 %v169_v41  ;;  %v861_v26 = vpack.c.bf16 %v255_v25, %v254_v24  ;;  %v646_v29 = vld [vmem:[%s1410_s2] ss:$0 sm:$0xff]  ;;  %s1366_s5 = scalar_lea.hbm %s1411_s3, %s649_s7  ;;  %s913_s26 = sshll.u32 %s976_s16, 4  ;;  %s914_s26 = int_to_ptr.vmem [resolvable:$false] %s913_s26 }
  0x31   : > { %834 = vmatpush3.bf16.msra.mxu0 %v833_v42  ;;  %489 = vmatprep.mubr.f32.mxu0 %v174_v49  ;;  %s915_s27 = scalar_lea.vmem %s914_s26, 256  ;;  %p916_p0 = scmp.lt.s32.totalorder %s1368_s19, %s914_s26 }
  0x32   : > { %420 = vmatmul.mubr.f32.vlgmr.msra.gmra.mrb[0].mxu1 %v171_v43  ;;  %836 = vmatprep.subr.bf16.mxu0 %v835_v45  ;;  %p917_p1 = scmp.lt.s32.totalorder %s915_s27, %s909_s25 }
  0x33   : > { %865 = vmatpush3.bf16.msra.mxu1 %v864_v53  ;;  %764 = vmatprep.mubr.msk.f32.mxu1 %vm974_vm0, %v975_v60 }
  0x34   : > { %p918_p2 = por %p917_p1, %p916_p0 }
  0x35   : > { %838 = vmatpush3.bf16.msra.mxu0 %v837_v54 }
  0x36   : > { %840 = vmatprep.subr.bf16.mxu0 %v839_v55  ;;  %765 = vmatmul.mubr.msk.f32.vlgmr.msra.gmra.mrb[2].mxu1 %vm281_vm1, %v175_v61  ;;  %p919_p3 = pnand %p918_p2, %p912_p13 }
  0x39   : > { %842 = vmatpush3.bf16.msra.mxu0 %v841_v62 }
  0x3a   : > { %844 = vmatprep.subr.bf16.mxu0 %v843_v63 }
  0x3d   : > { %846 = vmatpush3.bf16.msra.mxu0 %v845_v4 }
  0x3e   : > { %848 = vmatprep.subr.bf16.mxu0 %v847_v5 }
  0x41   : > { %850 = vmatpush3.bf16.msra.mxu0 %v849_v10 }
  0x42   : > { %852 = vmatprep.subr.bf16.mxu0 %v851_v11 }
  0x45   : > { %854 = vmatpush3.bf16.msra.mxu0 %v853_v16 }
  0x46   : > { %856 = vmatprep.subr.bf16.mxu0 %v855_v17 }
  0x49   : > { %858 = vmatpush3.bf16.msra.mxu0 %v857_v22 }
  0x4a   : > { %860 = vmatprep.subr.bf16.mxu0 %v859_v23 }
  0x4d   : > { %862 = vmatpush3.bf16.msra.mxu0 %v861_v26 }
  0x50   : > { %490 = vmatmul.mubr.f32.vlgmr.msra.gmra.mrb[2].mxu0 %v173_v27 }
 0x103   : > { %v684_v28 = vpop.f32.mrb[0].mxu0 }
 0x104   : > { %v685_v30 = vpop.f32.mrb[1].mxu0 }
 0x105   : > { %v719_v31 = vpop.f32.mrb[0].mxu1  ;;  %v686_v32 = vadd.f32 %v685_v30, %v684_v28 }
 0x106   : > { %v720_v33 = vpop.f32.mrb[1].mxu1 }
 0x107   : > { %v721_v34 = vadd.f32 %v720_v33, %v719_v31  ;;  %v352_v35 = vadd.f32 %v686_v32, %v646_v29 }
 0x109   : > { %v422_v36 = vadd.f32 %v721_v34, %v352_v35  ;;  %v561_v37 = vpop.f32.mrb[2].mxu1 }
 0x10a   : > { %v766_v38 = vpop.f32.mrb[3].mxu1 }
 0x123   : > { %v754_v39 = vpop.f32.mrb[2].mxu0 }
 0x124   : > { %v755_v40 = vpop.f32.mrb[3].mxu0 }
 0x125   : > { %v756_v41 = vadd.f32 %v755_v40, %v754_v39 }
 0x127   : > { %v492_v42 = vadd.f32 %v756_v41, %v422_v36 }
 0x129   : > { %v562_v43 = vadd.f32 %v561_v37, %v492_v42 }
 0x12b   : > { %566 = vst.msk [vmem:[%s163_s17] sm:$0xff] %vm565_vm2, %v562_v43 }
 0x12c   : > { %922 = shalt.err (!%p919_p3)
}
 0x12d   : > { %s923_s28 = scalar_lea.hbm %s1366_s5, 128  ;;  %s927_s6 = scalar_lea.hbm %s1411_s3, 256 }
 0x12e   : > { %p924_p4 = scmp.ne.s32.totalorder %s1366_s5, %s923_s28  ;;  %p928_p9 = scmp.lt.u32.totalorder %s1366_s5, %s1411_s3 }
 0x12f   : > { %p929_p10 = scmp.lt.u32.totalorder %s927_s6, %s923_s28  ;;  %p931_p12 = scmp.lt.u32.totalorder %s923_s28, %s1366_s5 }
 0x130   : > { %p925_p7 = pnand %p924_p4, %p1035_p5 }
 0x131   : > { %p930_p11 = por %p929_p10, %p928_p9 }
 0x132   : > { %p926_p8 = pneg %p925_p7 }
 0x133   : > { %p932_p13 = por %p931_p12, %p930_p11 }
 0x135   : > { %p933_p0 = pnand %p932_p13, %p926_p8 }
 0x137   : > { %936 = shalt.err (!%p933_p0)
}
 0x138   : > { %867 = dma.vmem_to_hbm [thread:$0]  (%p1035_p5), %s1368_s19, 128, %s1366_s5, %s568_s24  }
 0x139 PF: > { %p873_p1 = scmp.ge.s32.totalorder %s971_s15, 2  ;;  %s593_s10 = sand.u32 1, %s959_s12  }
 0x13a   : > { %s594_s11 = scalar_lea.sflag [#allocation3], %s593_s10 }
 0x13b   : > { %p870_p2 = pnand %p873_p1, %p1039_p6 }
 0x13d   : > { %954 = dma.done.wait (!%p870_p2), %s594_s11, 128  }
 0x13e   : > { %956 = vsyncadd (!%p870_p2), %s594_s11, 4294967168  ;;  %p13_p3 = scmp.ge.s32.totalorder %s1022_s18, 4   ;;  %s1414_s12 = smov %s963_s13 }
 0x13f   : > { %s1415_s13 = smov %s967_s14  ;;  %s1416_s14 = smov %s1033_s21 }
 0x140   : > { %s1417_s15 = smov %s1022_s18  ;;  %15 = sbr.rel (!%p13_p3) target bundleno = 3 (0x3), region = 67 }
 0x147   :  { %599 = vsyncpa [#allocation3], 1 }
 0x148   :  { %601 = vsyncpa [#allocation3 + $0x1], 1 }

</bundles_post_ra>
